<compile_context>
chip_gen: v5e
topology: v5e:2x2
jax: 0.10.0
libtpu: 0.0.40
codegen_flags: <defaults>
</compile_context>

<pallas_src>
import jax
import jax.numpy as jnp
from jax import lax
from jax.experimental import pallas as pl
from jax.experimental.pallas import tpu as pltpu

N_NODES = 16      # node_num (synthetic stand-in for nsl_kdd_nodes_num)
IN_CH = 32        # in_channel
OUT_CH = 32       # out_channel (== embedding dim, required by GraphLayer.message)
HEADS = 4
NEG_SLOPE = 0.2   # GraphLayer default negative_slope
BN_EPS = 1e-5     # nn.BatchNorm1d default eps
NEG_INF = -1e30   # additive mask for non-edges

WIDE = HEADS * N_NODES          # 64: head-stacked "wide" edge axis (h*N + j)
SLAB = 128                      # lane-dense packed output width per sample
assert 2 * WIDE == 128 and OUT_CH + WIDE <= SLAB

# const-slab row offsets (all multiples of 8 -> clean sublane tiling)
ROW_SW = 0                       # (IN_CH, 2*WIDE)  fused x -> [si_wide | sj_wide] weight
ROW_EMB = ROW_SW + IN_CH         # (N, 2*WIDE)      static embedding score contribution
ROW_ADJ = ROW_EMB + N_NODES      # (N, 2*WIDE)      [additive adjacency mask | tiled identity]
ROW_BB = ROW_ADJ + N_NODES       # (WIDE, 2*WIDE)   [head-block all-ones | zeros]
ROW_BGB = ROW_BB + WIDE          # (8, 2*WIDE)      row 0 = [bias | gamma | beta | 0]
CONST_ROWS = ROW_BGB + 8


def gnn_layer_kernel(const_ref, wagg_ref, x_ref, xbd_ref, out_ref):
    """One grid step = one full GNNLayer forward for one sample (N=16 nodes).

    Layout: nodes on sublanes, the head-stacked wide axis (HEADS*N = 64) on
    lanes.  Dependent MXU chain: score-matmul -> softmax -> denom-matmul ->
    aggregation-matmul; the (H*N, H*Cin)@(H*Cin, Cout) xw matmul is independent
    and can overlap the softmax chain.
    """
    f32 = jnp.float32
    x = x_ref[0]                                       # (N, Cin)       f32
    x_bd = xbd_ref[0]                                  # (H*N, H*Cin)   bf16 block-diag x

    score_w = const_ref[ROW_SW:ROW_EMB, :]             # (Cin, 2*WIDE)
    emb_sc = const_ref[ROW_EMB:ROW_ADJ, :]             # (N,   2*WIDE)
    adj_ind = const_ref[ROW_ADJ:ROW_BB, :]             # (N,   2*WIDE)
    bb = const_ref[ROW_BB:ROW_BGB, 0:WIDE]             # (WIDE, WIDE) head-block ones
    bgb = const_ref[ROW_BGB:ROW_BGB + 1, :]            # (1, 2*WIDE)
    bias = bgb[:, 0:OUT_CH]
    gamma = bgb[:, OUT_CH:2 * OUT_CH]
    beta = bgb[:, 2 * OUT_CH:3 * OUT_CH]

    # Independent MXU matmul (128-deep contraction): per-head projected features
    # stacked on sublanes, xw_stacked[h*N + j, :] = (x @ w_h)[j, :].
    xw_stacked = jnp.dot(x_bd, wagg_ref[...], preferred_element_type=f32)   # (H*N, Cout)

    # Attention scores for all heads / both endpoints, one matmul + one add:
    # lanes [0, WIDE)  : si_wide[i, h*N+j] = si[i, h]   (target side, j-broadcast)
    # lanes [WIDE, 2W) : sj_wide[i, h*N+j] = sj[i, h]   (source side, j-broadcast)
    sw = jnp.dot(x, score_w, preferred_element_type=f32) + emb_sc           # (N, 2*WIDE)
    si_wide = sw[:, :WIDE]
    sj_wide = sw[:, WIDE:]
    adj_bias = adj_ind[:, :WIDE]                       # 0 on edges, -1e30 elsewhere
    ind = adj_ind[:, WIDE:]                            # tiled identity

    # transpose-free scatter: j_row[0, h*N+j] = sj[j, h]
    j_row = jnp.sum(sj_wide * ind, axis=0, keepdims=True)                   # (1, WIDE)

    logits = si_wide + j_row                                                # (N, WIDE)
    logits = jnp.where(logits > 0, logits, NEG_SLOPE * logits)              # leaky_relu
    masked = logits + adj_bias

    # Masked softmax over incoming edges, all heads at once.  Row max is taken
    # across all heads: exact (it cancels) and overflow-safe; masked lanes
    # underflow to exactly 0 because every row has a self-loop.
    # TODO(synk): switch to a per-head segment max if head logit ranges can
    # differ by ~88+ (the maximum() clamp below only prevents inf/NaN).
    m = jnp.max(masked, axis=1, keepdims=True)                              # (N, 1)
    e = jnp.exp(masked - m)                                                 # (N, WIDE)
    # per-head denominators already broadcast wide: s_wide[i, h*N+j] = sum_j' e[i, h*N+j']
    s_wide = jnp.dot(e, bb, preferred_element_type=f32)                     # (N, WIDE)
    alpha = e * pl.reciprocal(jnp.maximum(s_wide, f32(1e-30)), approx=True)

    # Edge aggregation for all heads fused into one MXU matmul.
    acc = jnp.dot(alpha, xw_stacked, preferred_element_type=f32)            # (N, Cout)

    # concat=False: mean over heads folded into a constant multiply + bias.
    out = acc * f32(1.0 / HEADS) + bias

    # BatchNorm1d (training-mode forward: batch statistics over this sample's
    # N rows, biased variance) + ReLU.
    # TODO(synk): BN running-stat (momentum) buffers are not modeled; for a
    # GDN-style "one big batched graph" the stats would need a cross-grid-step
    # reduction instead of per-sample stats.
    mean = jnp.mean(out, axis=0, keepdims=True)
    var = jnp.mean((out - mean) ** 2, axis=0, keepdims=True)
    bn = (out - mean) * lax.rsqrt(var + BN_EPS) * gamma + beta
    act = jnp.maximum(bn, 0.0)

    # Lane-dense packed writeback: [ relu(bn(out)) | alpha_wide | pad ] -> 128 lanes.
    pad = jnp.zeros((N_NODES, SLAB - OUT_CH - WIDE), f32)
    out_ref[0] = jnp.concatenate([act, alpha, pad], axis=1)


def _build_static_consts(adj, embedding, params):
    """Fold every per-call-static piece into one f32 slab + one bf16 weight."""
    f32 = jnp.float32
    n = adj.shape[0]
    eye_h = jnp.eye(HEADS, dtype=f32)
    r2 = jnp.kron(eye_h, jnp.ones((1, n), f32))                     # (H, H*N) head-block broadcast

    # Block-diagonal per-head attention vectors folded through w (static):
    a_i_bd = jnp.einsum("hc,hg->hcg", params["att_i"], eye_h).reshape(HEADS * OUT_CH, HEADS)
    a_j_bd = jnp.einsum("hc,hg->hcg", params["att_j"], eye_h).reshape(HEADS * OUT_CH, HEADS)
    w_x_i = params["w"] @ a_i_bd                                     # (Cin, H)
    w_x_j = params["w"] @ a_j_bd                                     # (Cin, H)
    score_w = jnp.concatenate([w_x_i @ r2, w_x_j @ r2], axis=1)      # (Cin, 2*WIDE)

    # Embedding contribution to the scores is static (embedding shared across batch).
    emb_si = (embedding @ params["att_em_i"].T) @ r2                 # (N, WIDE)
    emb_sj = (embedding @ params["att_em_j"].T) @ r2                 # (N, WIDE)
    emb_sc = jnp.concatenate([emb_si, emb_sj], axis=1)               # (N, 2*WIDE)

    adj_bias = jnp.tile(jnp.where(adj > 0, f32(0.0), f32(NEG_INF)), (1, HEADS))   # (N, WIDE)
    ind = jnp.tile(jnp.eye(n, dtype=f32), (1, HEADS))                # (N, WIDE)
    adj_ind = jnp.concatenate([adj_bias, ind], axis=1)               # (N, 2*WIDE)

    bb = jnp.kron(eye_h, jnp.ones((n, n), f32))                      # (WIDE, WIDE)
    bb_pad = jnp.concatenate([bb, jnp.zeros((WIDE, WIDE), f32)], axis=1)  # (WIDE, 2*WIDE)

    bgb = jnp.zeros((8, 2 * WIDE), f32)
    bgb = bgb.at[0, 0:OUT_CH].set(params["bias"][0])
    bgb = bgb.at[0, OUT_CH:2 * OUT_CH].set(params["bn_gamma"][0])
    bgb = bgb.at[0, 2 * OUT_CH:3 * OUT_CH].set(params["bn_beta"][0])

    const = jnp.concatenate([score_w, emb_sc, adj_ind, bb_pad, bgb], axis=0)
    assert const.shape == (CONST_ROWS, 2 * WIDE)

    # (H*Cin, Cout) head-major reshape of w for the block-diagonal aggregation matmul.
    w_r = (params["w"].reshape(IN_CH, HEADS, OUT_CH)
           .transpose(1, 0, 2).reshape(HEADS * IN_CH, OUT_CH)).astype(jnp.bfloat16)
    return const, w_r


def gnn_layer_pallas(xb, adj, embedding, params):
    """Batched dense GNNLayer forward.

    xb: (B, N, Cin).  Returns (relu(bn(out)) of shape (B, N, Cout),
    dense attention alpha of shape (B, HEADS, N, N)).
    """
    f32 = jnp.float32
    B, n, cin = xb.shape
    assert (n, cin) == (N_NODES, IN_CH)

    const, wagg = _build_static_consts(adj, embedding, params)
    eye_h = jnp.eye(HEADS, dtype=f32)
    # Block-diagonal x per sample: x_bd[b, h*N+j, h*Cin+c] = x[b, j, c]   (bf16 halves DMA bytes).
    x_bd = jnp.einsum("hg,bjc->bhjgc", eye_h, xb).reshape(B, HEADS * n, HEADS * cin)
    x_bd = x_bd.astype(jnp.bfloat16)

    # TODO(synk): for large node counts, add grid axes over row-blocks of the
    # wide axis and re-budget the per-step working set for v7x's 64 MiB VMEM.
    slab = pl.pallas_call(
        gnn_layer_kernel,
        out_shape=jax.ShapeDtypeStruct((B, n, SLAB), f32),
        grid_spec=pltpu.PrefetchScalarGridSpec(
            num_scalar_prefetch=0,
            grid=(B,),
            in_specs=[
                # static: same block every step -> DMA'd once, stays resident.
                pl.BlockSpec(const.shape, lambda b: (0, 0)),
                pl.BlockSpec(wagg.shape, lambda b: (0, 0)),
                # per-sample: pipelined / double-buffered over the batch grid.
                pl.BlockSpec((1, n, cin), lambda b: (b, 0, 0)),
                pl.BlockSpec((1, HEADS * n, HEADS * cin), lambda b: (b, 0, 0)),
            ],
            out_specs=pl.BlockSpec((1, n, SLAB), lambda b: (b, 0, 0)),
        ),
        compiler_params=pltpu.CompilerParams(
            dimension_semantics=("parallel",)),      # batch sharded across v7x's 2 TCs
    )(const, wagg, xb, x_bd)

    act = slab[:, :, :OUT_CH]                                           # (B, N, Cout)
    alpha_wide = slab[:, :, OUT_CH:OUT_CH + WIDE]                       # (B, N, H*N)
    alpha_dense = alpha_wide.reshape(B, n, HEADS, n).transpose(0, 2, 1, 3)   # (B, H, N, N)
    return act, alpha_dense


def gnn_layer_forward(xb, edge_index, embedding, params):
    """Full GNNLayer.forward semantics for a batch of B independent invocations
    that share the graph structure and node embedding (GDN setting)."""
    n = xb.shape[1]
    src, tgt = edge_index[0], edge_index[1]

    # remove_self_loops (edge_index is concrete here, boolean masking is fine)
    keep = src != tgt
    src, tgt = src[keep], tgt[keep]
    # add_self_loops (appended at the end, matching torch_geometric)
    loop = jnp.arange(n, dtype=edge_index.dtype)
    new_src = jnp.concatenate([src, loop])
    new_tgt = jnp.concatenate([tgt, loop])
    new_edge_index = jnp.stack([new_src, new_tgt])

    # dense adjacency: adj[target, source] = 1.0
    adj = jnp.zeros((n, n), jnp.float32).at[new_tgt, new_src].set(1.0)

    act, alpha_dense = gnn_layer_pallas(xb, adj, embedding, params)

    # per-edge attention weights, shape (B, E, heads, 1) as in the PyTorch module
    alpha_edges = alpha_dense[:, :, new_tgt, new_src].transpose(0, 2, 1)[..., None]
    return act, alpha_edges, new_edge_index


def init_params(key):
    ks = jax.random.split(key, 6)
    scale = 0.1
    return {
        "w": scale * jax.random.normal(ks[0], (IN_CH, HEADS * OUT_CH), jnp.float32),
        "att_i": scale * jax.random.normal(ks[1], (HEADS, OUT_CH), jnp.float32),
        "att_j": scale * jax.random.normal(ks[2], (HEADS, OUT_CH), jnp.float32),
        "att_em_i": scale * jax.random.normal(ks[3], (HEADS, OUT_CH), jnp.float32),
        "att_em_j": scale * jax.random.normal(ks[4], (HEADS, OUT_CH), jnp.float32),
        "bias": scale * jax.random.normal(ks[5], (1, OUT_CH), jnp.float32),
        "bn_gamma": jnp.ones((1, OUT_CH), jnp.float32),
        "bn_beta": jnp.zeros((1, OUT_CH), jnp.float32),
    }


def _reference_single(x, adj, embedding, p):
    """Pure-JAX reference of one GNNLayer invocation (per-head loop, f32)."""
    xw = x @ p["w"]
    acc = jnp.zeros((x.shape[0], OUT_CH), jnp.float32)
    alphas = []
    for h in range(HEADS):
        xh = xw[:, h * OUT_CH:(h + 1) * OUT_CH]
        si = (xh * p["att_i"][h]).sum(1, keepdims=True) + (embedding * p["att_em_i"][h]).sum(1, keepdims=True)
        sj = (xh * p["att_j"][h]).sum(1, keepdims=True) + (embedding * p["att_em_j"][h]).sum(1, keepdims=True)
        logits = si + sj.T
        logits = jnp.where(logits > 0, logits, NEG_SLOPE * logits)
        masked = jnp.where(adj > 0, logits, -1e30)
        e = jnp.exp(masked - masked.max(1, keepdims=True)) * adj
        a = e / e.sum(1, keepdims=True)
        alphas.append(a)
        acc = acc + a @ xh
    out = acc / HEADS + p["bias"]
    mean = out.mean(0, keepdims=True)
    var = ((out - mean) ** 2).mean(0, keepdims=True)
    bn = (out - mean) / jnp.sqrt(var + BN_EPS) * p["bn_gamma"] + p["bn_beta"]
    return jnp.maximum(bn, 0.0), jnp.stack(alphas)


if __name__ == "__main__":
    key = jax.random.PRNGKey(0)
    kx, ke, kp = jax.random.split(key, 3)

    B = 8
    x = jax.random.normal(kx, (B, N_NODES, IN_CH), jnp.float32)
    embedding = jax.random.normal(ke, (N_NODES, OUT_CH), jnp.float32)
    params = init_params(kp)

    # small directed graph: node i receives edges from (i+1)%N, (i+3)%N,
    # plus a few self-loops that the forward pass must strip and re-add.
    ids = jnp.arange(N_NODES, dtype=jnp.int32)
    src = jnp.concatenate([(ids + 1) % N_NODES, (ids + 3) % N_NODES, ids[:4]])
    tgt = jnp.concatenate([ids, ids, ids[:4]])
    edge_index = jnp.stack([src, tgt])

    out, att_weight, new_edge_index = gnn_layer_forward(x, edge_index, embedding, params)
    out = jax.block_until_ready(out)
    att_weight = jax.block_until_ready(att_weight)

    # correctness check against a pure-JAX per-sample reference.
    # Tolerances account for (a) the EUP approximate reciprocal in the softmax
    # normalisation, (b) bf16 operands on the aggregation matmuls, and (c) the
    # BatchNorm std division amplifying small absolute errors.
    n = x.shape[1]
    s, t = edge_index[0], edge_index[1]
    keep = s != t
    loop = jnp.arange(n, dtype=jnp.int32)
    ns, nt = jnp.concatenate([s[keep], loop]), jnp.concatenate([t[keep], loop])
    adj = jnp.zeros((n, n), jnp.float32).at[nt, ns].set(1.0)
    ref_out, ref_alpha = [], []
    for b in range(B):
        o, a = _reference_single(x[b], adj, embedding, params)
        ref_out.append(o)
        ref_alpha.append(a)
    ref_out = jnp.stack(ref_out)                       # (B, N, Cout)
    ref_alpha = jnp.stack(ref_alpha)                   # (B, H, N, N)

    assert out.shape == (B, N_NODES, OUT_CH)
    assert att_weight.shape == (B, new_edge_index.shape[1], HEADS, 1)
    assert jnp.allclose(out, ref_out, atol=3e-2, rtol=3e-2)
    assert jnp.allclose(att_weight[..., 0],
                        ref_alpha[:, :, nt, ns].transpose(0, 2, 1), atol=1e-2)

    print("KERNEL_OK")
</pallas_src>

<mosaic_0001>
module attributes {stable_mosaic.version = 11 : i64} {
  func.func @gnn_layer_kernel(%arg0: i32, %arg1: memref<136x128xf32, #tpu.memory_space<vmem>>, %arg2: memref<128x32xbf16, #tpu.memory_space<vmem>>, %arg3: memref<1x16x32xf32, #tpu.memory_space<vmem>>, %arg4: memref<1x64x128xbf16, #tpu.memory_space<vmem>>, %arg5: memref<1x16x128xf32, #tpu.memory_space<vmem>>) attributes {dimension_semantics = [#tpu.dimension_semantics<parallel>], iteration_bounds = array<i64: 8>, scalar_prefetch = 0 : i64, scratch_operands = 0 : i64, tpu.core_type = #tpu.core_type<tc>, window_params = [{pipeline_mode = #tpu.pipeline_mode<synchronous>, transform_indices = @transform_0, window_bounds = array<i64: 136, 128>}, {pipeline_mode = #tpu.pipeline_mode<synchronous>, transform_indices = @transform_1, window_bounds = array<i64: 128, 32>}, {transform_indices = @transform_2, window_bounds = array<i64: 1, 16, 32>}, {transform_indices = @transform_3, window_bounds = array<i64: 1, 64, 128>}, {transform_indices = @transform_4, window_bounds = array<i64: 1, 16, 128>}]} {
    %c0 = arith.constant 0 : index
    %c0_0 = arith.constant 0 : index
    %c0_1 = arith.constant 0 : index
    %0 = vector.load %arg3[%c0, %c0_0, %c0_1] : memref<1x16x32xf32, #tpu.memory_space<vmem>>, vector<1x16x32xf32>
    %1 = vector.shape_cast %0 : vector<1x16x32xf32> to vector<16x32xf32>
    %c0_2 = arith.constant 0 : index
    %c0_3 = arith.constant 0 : index
    %c0_4 = arith.constant 0 : index
    %2 = vector.load %arg4[%c0_2, %c0_3, %c0_4] : memref<1x64x128xbf16, #tpu.memory_space<vmem>>, vector<1x64x128xbf16>
    %3 = vector.shape_cast %2 : vector<1x64x128xbf16> to vector<64x128xbf16>
    %c0_5 = arith.constant 0 : index
    %c0_6 = arith.constant 0 : index
    %4 = vector.load %arg1[%c0_5, %c0_6] : memref<136x128xf32, #tpu.memory_space<vmem>>, vector<32x128xf32>
    %c32 = arith.constant 32 : index
    %c0_7 = arith.constant 0 : index
    %5 = vector.load %arg1[%c32, %c0_7] : memref<136x128xf32, #tpu.memory_space<vmem>>, vector<16x128xf32>
    %c48 = arith.constant 48 : index
    %c0_8 = arith.constant 0 : index
    %6 = vector.load %arg1[%c48, %c0_8] : memref<136x128xf32, #tpu.memory_space<vmem>>, vector<16x128xf32>
    %c64 = arith.constant 64 : index
    %c0_9 = arith.constant 0 : index
    %7 = vector.load %arg1[%c64, %c0_9] : memref<136x128xf32, #tpu.memory_space<vmem>>, vector<64x64xf32>
    %c128 = arith.constant 128 : index
    %c0_10 = arith.constant 0 : index
    %8 = vector.load %arg1[%c128, %c0_10] : memref<136x128xf32, #tpu.memory_space<vmem>>, vector<1x128xf32>
    %9 = vector.extract_strided_slice %8 {offsets = [0, 0], sizes = [1, 32], strides = [1, 1]} : vector<1x128xf32> to vector<1x32xf32>
    %10 = vector.extract_strided_slice %8 {offsets = [0, 32], sizes = [1, 32], strides = [1, 1]} : vector<1x128xf32> to vector<1x32xf32>
    %11 = vector.extract_strided_slice %8 {offsets = [0, 64], sizes = [1, 32], strides = [1, 1]} : vector<1x128xf32> to vector<1x32xf32>
    %c0_11 = arith.constant 0 : index
    %c0_12 = arith.constant 0 : index
    %12 = vector.load %arg2[%c0_11, %c0_12] : memref<128x32xbf16, #tpu.memory_space<vmem>>, vector<128x32xbf16>
    %cst = arith.constant dense<0.000000e+00> : vector<64x32xf32>
    %13 = tpu.matmul %3, %12, %cst {dimension_numbers = #tpu.dot_dimension_numbers<[1], [0], [0], [1], [0, 0, 1, 1], [], []>} : vector<64x128xbf16>, vector<128x32xbf16>, vector<64x32xf32> -> vector<64x32xf32>
    %cst_13 = arith.constant dense<0.000000e+00> : vector<16x128xf32>
    %14 = tpu.matmul %1, %4, %cst_13 {dimension_numbers = #tpu.dot_dimension_numbers<[1], [0], [0], [1], [0, 0, 1, 1], [], []>} : vector<16x32xf32>, vector<32x128xf32>, vector<16x128xf32> -> vector<16x128xf32>
    %15 = arith.addf %14, %5 : vector<16x128xf32>
    %16 = vector.extract_strided_slice %15 {offsets = [0, 0], sizes = [16, 64], strides = [1, 1]} : vector<16x128xf32> to vector<16x64xf32>
    %17 = vector.extract_strided_slice %15 {offsets = [0, 64], sizes = [16, 64], strides = [1, 1]} : vector<16x128xf32> to vector<16x64xf32>
    %18 = vector.extract_strided_slice %6 {offsets = [0, 0], sizes = [16, 64], strides = [1, 1]} : vector<16x128xf32> to vector<16x64xf32>
    %19 = vector.extract_strided_slice %6 {offsets = [0, 64], sizes = [16, 64], strides = [1, 1]} : vector<16x128xf32> to vector<16x64xf32>
    %20 = arith.mulf %17, %19 : vector<16x64xf32>
    %cst_14 = arith.constant dense<0.000000e+00> : vector<64xf32>
    %21 = vector.multi_reduction <add>, %20, %cst_14 [0] : vector<16x64xf32> to vector<64xf32>
    %22 = vector.shape_cast %21 : vector<64xf32> to vector<1x64xf32>
    %23 = vector.broadcast %22 : vector<1x64xf32> to vector<16x64xf32>
    %24 = arith.addf %16, %23 : vector<16x64xf32>
    %cst_15 = arith.constant 0.000000e+00 : f32
    %25 = vector.broadcast %cst_15 : f32 to vector<16x64xf32>
    %26 = arith.cmpf ogt, %24, %25 : vector<16x64xf32>
    %cst_16 = arith.constant 2.000000e-01 : f32
    %27 = vector.broadcast %cst_16 : f32 to vector<16x64xf32>
    %28 = arith.mulf %27, %24 : vector<16x64xf32>
    %29 = arith.select %26, %24, %28 : vector<16x64xi1>, vector<16x64xf32>
    %30 = arith.addf %29, %18 : vector<16x64xf32>
    %cst_17 = arith.constant dense<0xFF800000> : vector<16xf32>
    %31 = vector.multi_reduction <maximumf>, %30, %cst_17 [1] : vector<16x64xf32> to vector<16xf32>
    %32 = vector.shape_cast %31 : vector<16xf32> to vector<16x1xf32>
    %33 = vector.broadcast %32 : vector<16x1xf32> to vector<16x64xf32>
    %34 = arith.subf %30, %33 : vector<16x64xf32>
    %35 = math.exp %34 : vector<16x64xf32>
    %cst_18 = arith.constant dense<0.000000e+00> : vector<16x64xf32>
    %36 = tpu.matmul %35, %7, %cst_18 {dimension_numbers = #tpu.dot_dimension_numbers<[1], [0], [0], [1], [0, 0, 1, 1], [], []>} : vector<16x64xf32>, vector<64x64xf32>, vector<16x64xf32> -> vector<16x64xf32>
    %cst_19 = arith.constant 1.000000e-30 : f32
    %37 = vector.broadcast %cst_19 : f32 to vector<16x64xf32>
    %38 = arith.maximumf %36, %37 : vector<16x64xf32>
    %39 = tpu.reciprocal %38 {approx = true} : vector<16x64xf32> -> vector<16x64xf32>
    %40 = arith.mulf %35, %39 : vector<16x64xf32>
    %cst_20 = arith.constant dense<0.000000e+00> : vector<16x32xf32>
    %41 = tpu.matmul %40, %13, %cst_20 {dimension_numbers = #tpu.dot_dimension_numbers<[1], [0], [0], [1], [0, 0, 1, 1], [], []>} : vector<16x64xf32>, vector<64x32xf32>, vector<16x32xf32> -> vector<16x32xf32>
    %cst_21 = arith.constant 2.500000e-01 : f32
    %42 = vector.broadcast %cst_21 : f32 to vector<16x32xf32>
    %43 = arith.mulf %41, %42 : vector<16x32xf32>
    %44 = vector.broadcast %9 : vector<1x32xf32> to vector<16x32xf32>
    %45 = arith.addf %43, %44 : vector<16x32xf32>
    %cst_22 = arith.constant dense<0.000000e+00> : vector<32xf32>
    %46 = vector.multi_reduction <add>, %45, %cst_22 [0] : vector<16x32xf32> to vector<32xf32>
    %47 = vector.shape_cast %46 : vector<32xf32> to vector<1x32xf32>
    %cst_23 = arith.constant 1.600000e+01 : f32
    %48 = vector.broadcast %cst_23 : f32 to vector<1x32xf32>
    %49 = arith.divf %47, %48 : vector<1x32xf32>
    %50 = vector.broadcast %49 : vector<1x32xf32> to vector<16x32xf32>
    %51 = arith.subf %45, %50 : vector<16x32xf32>
    %52 = arith.mulf %51, %51 : vector<16x32xf32>
    %cst_24 = arith.constant dense<0.000000e+00> : vector<32xf32>
    %53 = vector.multi_reduction <add>, %52, %cst_24 [0] : vector<16x32xf32> to vector<32xf32>
    %54 = vector.shape_cast %53 : vector<32xf32> to vector<1x32xf32>
    %cst_25 = arith.constant 1.600000e+01 : f32
    %55 = vector.broadcast %cst_25 : f32 to vector<1x32xf32>
    %56 = arith.divf %54, %55 : vector<1x32xf32>
    %57 = vector.broadcast %49 : vector<1x32xf32> to vector<16x32xf32>
    %58 = arith.subf %45, %57 : vector<16x32xf32>
    %cst_26 = arith.constant 9.99999974E-6 : f32
    %59 = vector.broadcast %cst_26 : f32 to vector<1x32xf32>
    %60 = arith.addf %56, %59 : vector<1x32xf32>
    %61 = math.rsqrt %60 : vector<1x32xf32>
    %62 = vector.broadcast %61 : vector<1x32xf32> to vector<16x32xf32>
    %63 = arith.mulf %58, %62 : vector<16x32xf32>
    %64 = vector.broadcast %10 : vector<1x32xf32> to vector<16x32xf32>
    %65 = arith.mulf %63, %64 : vector<16x32xf32>
    %66 = vector.broadcast %11 : vector<1x32xf32> to vector<16x32xf32>
    %67 = arith.addf %65, %66 : vector<16x32xf32>
    %cst_27 = arith.constant 0.000000e+00 : f32
    %68 = vector.broadcast %cst_27 : f32 to vector<16x32xf32>
    %69 = arith.maximumf %67, %68 : vector<16x32xf32>
    %cst_28 = arith.constant 0.000000e+00 : f32
    %70 = vector.broadcast %cst_28 : f32 to vector<16x32xf32>
    %71 = tpu.concatenate %69, %40, %70 in 1 : vector<16x32xf32>, vector<16x64xf32>, vector<16x32xf32> -> vector<16x128xf32>
    %c0_29 = arith.constant 0 : index
    %c0_30 = arith.constant 0 : index
    %c0_31 = arith.constant 0 : index
    %72 = vector.load %arg5[%c0_29, %c0_30, %c0_31] : memref<1x16x128xf32, #tpu.memory_space<vmem>>, vector<1x16x128xf32>
    %73 = vector.shape_cast %72 : vector<1x16x128xf32> to vector<16x128xf32>
    %74 = vector.shape_cast %71 : vector<16x128xf32> to vector<1x16x128xf32>
    tpu.vector_store %arg5[%c0_29, %c0_30, %c0_31], %74 {strides = array<i32>} : memref<1x16x128xf32, #tpu.memory_space<vmem>>, vector<1x16x128xf32>,
    return
  }
  func.func @transform_0(%arg0: i32) -> (i32, i32) {
    %c0_i32 = arith.constant 0 : i32
    %c0_i32_0 = arith.constant 0 : i32
    %c0_i32_1 = arith.constant 0 : i32
    return %c0_i32, %c0_i32_0 : i32, i32
  }
  func.func @transform_1(%arg0: i32) -> (i32, i32) {
    %c0_i32 = arith.constant 0 : i32
    %c0_i32_0 = arith.constant 0 : i32
    %c0_i32_1 = arith.constant 0 : i32
    return %c0_i32, %c0_i32_0 : i32, i32
  }
  func.func @transform_2(%arg0: i32) -> (i32, i32, i32) {
    %c0_i32 = arith.constant 0 : i32
    %c0_i32_0 = arith.constant 0 : i32
    %c0_i32_1 = arith.constant 0 : i32
    return %arg0, %c0_i32, %c0_i32_0 : i32, i32, i32
  }
  func.func @transform_3(%arg0: i32) -> (i32, i32, i32) {
    %c0_i32 = arith.constant 0 : i32
    %c0_i32_0 = arith.constant 0 : i32
    %c0_i32_1 = arith.constant 0 : i32
    return %arg0, %c0_i32, %c0_i32_0 : i32, i32, i32
  }
  func.func @transform_4(%arg0: i32) -> (i32, i32, i32) {
    %c0_i32 = arith.constant 0 : i32
    %c0_i32_0 = arith.constant 0 : i32
    %c0_i32_1 = arith.constant 0 : i32
    return %arg0, %c0_i32, %c0_i32_0 : i32, i32, i32
  }
}

</mosaic_0001>

<bundles_post_ra>
// kernel: tpu_custom_call.1
= control target key start
LH: loop header
LB: loop body
LE: loop exit
PB: predicated region body
PF: predicated region fallthrough
CT: control target
= control target key end

     0   :  { %9 = vsyncpa [#allocation3], 0  ;;  %s1362_s0 = inlined_call_operand.hbm [shape: f32[136,128], index: 0, kind: input, shape index: {}]   ;;  %s1363_s1 = inlined_call_operand.vmem [shape: bf16[128,32], index: 1, kind: input, shape index: {}]   ;;  %s1364_s2 = inlined_call_operand.hbm [shape: f32[8,16,32], index: 2, kind: input, shape index: {}]   ;;  %s1365_s3 = inlined_call_operand.hbm [shape: bf16[8,64,128], index: 3, kind: input, shape index: {}]   ;;  %s1366_s4 = inlined_call_operand.hbm [shape: f32[8,16,128], index: 4, kind: output, shape index: {}]  }
   0x1   :  { %10 = vsyncpa [#allocation6], 0 }
   0x2   :  { %12 = vsyncpa [#allocation6 + $0x1], 0 }
   0x3   :  { %13 = vsyncpa [#allocation4], 0 }
   0x4   :  { %15 = vsyncpa [#allocation4 + $0x1], 0  ;;  %s1135_s15 = smov 0   ;;  %s1137_s16 = smov 0  }
   0x5   :  { %s1139_s17 = smov 0   ;;  %s1141_s18 = smov 0  }
   0x6 LB: > { %s1156_s19 = sadd.s32 1, %s1097_s18   ;;  %s70_s20 = sadd.s32 1, %s1093_s17  ;;  %s1097_s18 = sphi %s1141_s18, %s1378_s18   ;;  %s1093_s17 = sphi %s1139_s17, %s1377_s17   ;;  %s1089_s16 = sphi %s1137_s16, %s1376_s16   ;;  %s1085_s15 = sphi %s1135_s15, %s1375_s15  }
   0x7   : > { %s67_s21 = ssub.s32 %s1097_s18, %s1156_s19  ;;  %p77_p0 = scmp.ne.s32.totalorder %s1093_s17, %s1089_s16 }
   0x8   : > { %p68_p1 = scmp.eq.s32.totalorder %s67_s21, 0  ;;  %p78_p2 = scmp.eq.s32.totalorder %s1097_s18, 0 }
   0x9   : > { %p878_p4 = scmp.lt.s32.totalorder %s1097_s18, 8  ;;  %s176_s23 = sand.u32 1, %s1097_s18  }
   0xa   : > { %s1165_s22 = scalar_select %p68_p1, %s1093_s17, %s70_s20  }
   0xb   : > { %p79_p3 = por %p78_p2, %p77_p0  ;;  %s178_s24 = sand.u32 1, %s1093_s17  }
   0xc   : > { %s751_s25 = sshll.u32 %s178_s24, 4  ;;  %s821_s26 = sshll.u32 %s1097_s18, 4 }
   0xd   : > { %s185_s29 = scalar_lea.hbm %s1364_s2, %s821_s26  ;;  %s180_s5 = scalar_lea.vmem [#allocation5], %s751_s25 }
   0xe   : > { %s186_s30 = sshll.u32 %s185_s29, 4  ;;  %s188_s6 = sshll.u32 %s180_s5, 4  ;;  %s187_s30 = int_to_ptr.hbm [resolvable:$true] %s186_s30  ;;  %s189_s6 = int_to_ptr.vmem [resolvable:$true] %s188_s6 }
   0xf   : > { %p1177_p5 = pnand %p878_p4, %p79_p3  ;;  %s754_s8 = sshll.u32 %s178_s24, 5 }
  0x10   : > { %s202_s9 = scalar_lea.vmem [#allocation7], %s754_s8  ;;  %s1183_s11 = scalar_lea.sflag [#allocation6], %s176_s23 }
  0x11   : > { %s1181_s10 = sshll.u32 %s202_s9, 4  ;;  %s937_s12 = sshra.s32 %s187_s30, 4  ;;  %s938_s12 = int_to_ptr.hbm [resolvable:$true] %s937_s12  ;;  %s211_s10 = int_to_ptr.vmem [resolvable:$true] %s1181_s10 }
  0x12   : > { %s939_s13 = scalar_lea.hbm %s938_s12, 16  ;;  %p941_p7 = pneg %p1177_p5 }
  0x13   : > { %p940_p6 = scmp.ne.s32.totalorder %s938_s12, %s939_s13  ;;  %s944_s21 = scalar_lea.hbm %s1364_s2, 128 }
  0x14   : > { %p945_p10 = scmp.lt.s32.totalorder %s938_s12, %s1364_s2  ;;  %p946_p11 = scmp.lt.s32.totalorder %s944_s21, %s939_s13 }
  0x15   : > { %p942_p8 = pnand %p941_p7, %p940_p6 }
  0x16   : > { %p947_p12 = por %p946_p11, %p945_p10 }
  0x17   : > { %p943_p9 = pneg %p942_p8 }
  0x19   : > { %p948_p13 = pnand %p947_p12, %p943_p9 }
  0x1b   : > { %951 = shalt.err (!%p948_p13)
}
  0x1c   : > { %s1099_s23 = smov 128   ;;  %s1100_s26 = smov 8  }
  0x1d   : > { %869 = dma.hbm_to_vmem [thread:$0]  (!%p1177_p5), %s187_s30, 256, %s189_s6, %s1183_s11, %s1099_s23, %s1099_s23, %s1100_s26  }
  0x1e   : > { %s1203_s27 = sadd.s32 4294967295, %s1097_s18   ;;  %s747_s28 = sadd.s32 4294967294, %s1097_s18  }
  0x1f   : > { %p83_p1 = scmp.ne.s32.totalorder %s1089_s16, %s1085_s15  ;;  %p1367_p2 = scmp.eq.s32.totalorder %s1203_s27, 0 }
  0x20   : > { %p133_p3 = scmp.eq.s32.totalorder %s1203_s27, 7  ;;  %p139_p4 = scmp.eq.s32.totalorder %s747_s28, 7 }
  0x21   : > { %p748_p6 = scmp.ge.s32.totalorder %s1097_s18, 1  ;;  %p1213_p8 = por %p1367_p2, %p83_p1 }
  0x22   : > { %p1220_p9 = por %p133_p3, %p77_p0  ;;  %p1224_p10 = por %p139_p4, %p83_p1 }
  0x23   : > { %p146_p11 = scmp.lt.s32.totalorder %s1097_s18, 9  ;;  %s157_s9 = sshll.u32 %s1362_s0, 4  ;;  %s158_s9 = int_to_ptr.hbm [resolvable:$true] %s157_s9 }
  0x24   : > { %s822_s13 = sshll.u32 %s1097_s18, 5  ;;  %s1101_s14 = smov [#allocation2]  }
  0x25   : > { %p1232_p12 = pnand %p748_p6, %p146_p11  ;;  %s159_s20 = sshll.u32 %s1101_s14, 4  ;;  %s160_s20 = int_to_ptr.vmem [resolvable:$true] %s159_s20 }
  0x26   : > { %s207_s25 = scalar_lea.hbm %s1365_s3, %s822_s13  ;;  %s1004_s13 = scalar_lea.hbm %s1365_s3, 256 }
  0x27   : > { %p862_p0 = pneg %p1232_p12  ;;  %s208_s28 = sshll.u32 %s207_s25, 4  ;;  %s209_s28 = int_to_ptr.hbm [resolvable:$true] %s208_s28 }
  0x28   : > { %s997_s6 = sshra.s32 %s209_s28, 4  ;;  %s998_s6 = int_to_ptr.hbm [resolvable:$true] %s997_s6 }
  0x29   : > { %p863_p13 = pnand %p862_p0, %p1367_p2  ;;  %s999_s8 = scalar_lea.hbm %s998_s6, 32 }
  0x2a   : > { %p1000_p1 = scmp.ne.s32.totalorder %s998_s6, %s999_s8  ;;  %p1005_p6 = scmp.lt.s32.totalorder %s998_s6, %s1365_s3 }
  0x2b   : > { %865 = dma.hbm_to_vmem [thread:$0]  (!%p863_p13), %s158_s9, 2176, %s160_s20, [#allocation3], %s1099_s23, %s1099_s23, %s1100_s26  }
  0x2c   : > { %p1002_p3 = pnand %p1000_p1, %p941_p7  ;;  %p1006_p11 = scmp.lt.s32.totalorder %s1004_s13, %s999_s8 }
  0x2e   : > { %p1003_p4 = pneg %p1002_p3  ;;  %p1007_p0 = por %p1006_p11, %p1005_p6 }
  0x30   : > { %p1008_p2 = pnand %p1007_p0, %p1003_p4 }
  0x32   : > { %1011 = shalt.err (!%p1008_p2)
}
  0x33   : > { %s1102_s23 = smov 64   ;;  %s1103_s26 = smov 4  }
  0x34   : > { %872 = dma.hbm_to_vmem [thread:$0]  (!%p1177_p5), %s209_s28, 512, %s211_s10, %s1183_s11, %s1102_s23, %s1102_s23, %s1103_s26  }
  0x35   : > { %222 = sbr.rel (%p1232_p12) target bundleno = 874 (0x36a), region = 36  ;;  %p1373_p7 = scmp.eq.s32.totalorder (!%p1232_p12), %s1203_s27, 0 }
  0x3a   : > { %1072 = dma.done.wait (%p1373_p7), [#allocation3], 2176   ;;  %p1374_p13 = pmov %p1373_p7 }
  0x3b   : > { %s229_s9 = sand.u32 1, %s1203_s27   ;;  %s1268_s20 = sand.u32 1, %s1089_s16  }
  0x3c   : > { %1074 = vsyncadd (%p1374_p13), [#allocation3], 4294965120  ;;  %s759_s6 = sshll.u32 %s1268_s20, 4  ;;  %s230_s7 = scalar_lea.sflag [#allocation6], %s229_s9 }
  0x3d   : > { %s1273_s10 = scalar_lea.vmem [#allocation5], %s759_s6 }
  0x3e   : > { %1076 = dma.done.wait (%p1213_p8), %s230_s7, 768  }
  0x3f   : > { %1078 = vsyncadd (%p1213_p8), %s230_s7, 4294966528  ;;  %v834_v0 = vld [vmem:[%s1363_s1 + $0x38] sm:$0xff]  ;;  %v833_v1 = vld [vmem:[%s1363_s1 + $0x30] sm:$0xff]  ;;  %s760_s11 = sshll.u32 %s1268_s20, 5  ;;  %vm418_vm0 = vcmask 261120   ;;  %vm450_vm1 = vcmask 1048064  }
  0x40   : > { %836 = vmatpush.bf16.msra.mxu1 %v834_v0  ;;  %837 = vmatpush.bf16.msra.mxu2 %v834_v0  ;;  %v832_v2 = vld [vmem:[%s1363_s1 + $0x28] sm:$0xff]  ;;  %v831_v3 = vld [vmem:[%s1363_s1 + $0x20] sm:$0xff]  ;;  %v830_v4 = vld [vmem:[%s1363_s1 + $0x18] sm:$0xff]  ;;  %s1304_s8 = scalar_lea.vmem [#allocation7], %s760_s11  ;;  %vm474_vm4 = vcmask 523264   ;;  %s1105_s14 = smov 96  }
  0x41   : > { %389 = vmatpush.bf16.msra.mxu0 %v834_v0  ;;  %v829_v5 = vld [vmem:[%s1363_s1 + $0x10] sm:$0xff]  ;;  %v828_v6 = vld [vmem:[%s1363_s1 + $0x8] sm:$0xff]  ;;  %v827_v7 = vld [vmem:[%s1363_s1] sm:$0xff]  ;;  %s1106_s21 = smov 32   ;;  %s835_s29 = sshll.u32 %s1203_s27, 4  ;;  %vm621_vm9 = vcmask 785408  }
  0x42   : > { %v287_v8 = vld [vmem:[#allocation2 + $0x18] sm:$0xff]  ;;  %v826_v10 = vld [vmem:[%s1304_s8 + $0x18] sm:$0xff]  ;;  %v286_v11 = vld [vmem:[#allocation2 + $0x10] sm:$0xff]  ;;  %s638_s25 = scalar_lea.hbm %s1366_s4, %s835_s29  ;;  %s273_s23 = scalar_lea.vmem [#allocation8], %s759_s6 }
  0x43   : > { %v825_v9 = vld [vmem:[%s1304_s8 + $0x10] sm:$0xff]  ;;  %v285_v12 = vld [vmem:[#allocation2 + $0x8] sm:$0xff]  ;;  %v284_v13 = vld [vmem:[#allocation2] sm:$0xff]  ;;  %s639_s26 = sshll.u32 %s273_s23, 4  ;;  %s641_s9 = sshll.u32 %s638_s25, 4  ;;  %s640_s26 = int_to_ptr.vmem [resolvable:$true] %s639_s26  ;;  %s642_s9 = int_to_ptr.hbm [resolvable:$true] %s641_s9 }
  0x44   : > { %838 = vmatpush.bf16.msra.mxu1 %v833_v1  ;;  %839 = vmatpush.bf16.msra.mxu2 %v833_v1  ;;  %v274_v14 = vld [vmem:[%s1273_s10] sm:$0xff]  ;;  %v275_v15 = vld [vmem:[%s1273_s10 + $0x8] sm:$0xff]  ;;  %s1104_s10 = smov 64   ;;  %s627_s27 = scalar_lea.sflag [#allocation4], %s1268_s20 }
  0x45   : > { %390 = vmatpush.bf16.msra.mxu0 %v833_v1  ;;  %v288_v21 = vld [vmem:[#allocation2 + $0x20] sm:$0xff]  ;;  %v290_v23 = vld [vmem:[#allocation2 + $0x30] sm:$0xff]  ;;  %v289_v24 = vld [vmem:[#allocation2 + $0x28] sm:$0xff]  ;;  %s1041_s7 = sshra.s32 %s642_s9, 4  ;;  %s1047_s28 = scalar_lea.hbm %s1366_s4, 128  ;;  %s1042_s7 = int_to_ptr.hbm [resolvable:$true] %s1041_s7 }
  0x46   : > { %v291_v25 = vld [vmem:[#allocation2 + $0x38] sm:$0xff]  ;;  %v823_v39 = vld [vmem:[%s1304_s8] sm:$0xff]  ;;  %v298_v41 = vld [vmem:[#allocation2 + $0x70] sm:$0xff]  ;;  %s1043_s6 = scalar_lea.hbm %s1042_s7, 16  ;;  %p1048_p12 = scmp.lt.s32.totalorder %s1042_s7, %s1366_s4 }
  0x47   : > { %v299_v40 = vld [vmem:[#allocation2 + $0x78] sm:$0xff]  ;;  %v297_v42 = vld [vmem:[#allocation2 + $0x68] sm:$0xff]  ;;  %v824_v43 = vld [vmem:[%s1304_s8 + $0x8] sm:$0xff]  ;;  %p1044_p5 = scmp.ne.s32.totalorder %s1042_s7, %s1043_s6  ;;  %p1049_p1 = scmp.lt.s32.totalorder %s1047_s28, %s1043_s6 }
  0x48   : > { %840 = vmatpush.bf16.msra.mxu1 %v832_v2  ;;  %841 = vmatpush.bf16.msra.mxu2 %v832_v2  ;;  %v296_v55 = vld [vmem:[#allocation2 + $0x60] sm:$0xff]  ;;  %v295_v56 = vld [vmem:[#allocation2 + $0x58] sm:$0xff]  ;;  %v294_v57 = vld [vmem:[#allocation2 + $0x50] sm:$0xff] }
  0x49   : > { %391 = vmatpush.bf16.msra.mxu0 %v832_v2  ;;  %v293_v58 = vld [vmem:[#allocation2 + $0x48] sm:$0xff]  ;;  %v292_v59 = vld [vmem:[#allocation2 + $0x40] sm:$0xff]  ;;  %p1045_p2 = pnand %p1044_p5, %p1220_p9  ;;  %p1050_p3 = por %p1049_p1, %p1048_p12 }
  0x4b   : > { %p1046_p8 = pneg %p1045_p2 }
  0x4c   : > { %842 = vmatpush.bf16.msra.mxu1 %v831_v3  ;;  %843 = vmatpush.bf16.msra.mxu2 %v831_v3 }
  0x4d   : > { %392 = vmatpush.bf16.msra.mxu0 %v831_v3  ;;  %p1051_p4 = pnand %p1050_p3, %p1046_p8 }
  0x50   : > { %844 = vmatpush.bf16.msra.mxu1 %v830_v4  ;;  %845 = vmatpush.bf16.msra.mxu2 %v830_v4 }
  0x51   : > { %393 = vmatpush.bf16.msra.mxu0 %v830_v4 }
  0x54   : > { %846 = vmatpush.bf16.msra.mxu1 %v829_v5  ;;  %847 = vmatpush.bf16.msra.mxu2 %v829_v5 }
  0x55   : > { %394 = vmatpush.bf16.msra.mxu0 %v829_v5 }
  0x58   : > { %848 = vmatpush.bf16.msra.mxu1 %v828_v6  ;;  %849 = vmatpush.bf16.msra.mxu2 %v828_v6 }
  0x59   : > { %395 = vmatpush.bf16.msra.mxu0 %v828_v6 }
  0x5c   : > { %850 = vmatpush.bf16.msra.mxu1 %v827_v7  ;;  %851 = vmatpush.bf16.msra.mxu2 %v827_v7 }
  0x5d   : > { %396 = vmatpush.bf16.msra.mxu0 %v827_v7 }
  0x5f   : > { %407 = vmatmul.bf16.vlgmr.msra.gmra.mxu1 %v825_v9  ;;  %412 = vmatmul.bf16.vlgmr.msra.gmra.mxu2 %v826_v10 }
  0x60   : > { %437 = vmatpush.msrb.mxu1 %v287_v8  ;;  %501 = vmatpush.msrb.mxu2 %v299_v40  ;;  %v924_v8 = vld [vmem:[#allocation2 + $0x80] ss:$0 sm:$0xff] }
  0x61   : > { %397 = vmatmul.bf16.vlgmr.msra.gmra.mxu0 %v823_v39  ;;  %606 = vrot.lane.b32.xlu2 %v924_v8, %s1104_s10 }
  0x62   : > { %438 = vmatpush.msrb.mxu1 %v286_v11  ;;  %502 = vmatpush.msrb.mxu2 %v298_v41 }
  0x64   : > { %439 = vmatpush.msrb.mxu1 %v285_v12  ;;  %503 = vmatpush.msrb.mxu2 %v297_v42 }
  0x66   : > { %440 = vmatpush.msrb.mxu1 %v284_v13  ;;  %504 = vmatpush.msrb.mxu2 %v296_v55 }
  0x68   : > { %505 = vmatpush.msrb.mxu2 %v295_v56 }
  0x6a   : > { %506 = vmatpush.msrb.mxu2 %v294_v57 }
  0x6c   : > { %507 = vmatpush.msrb.mxu2 %v293_v58 }
  0x6e   : > { %508 = vmatpush.msrb.mxu2 %v292_v59 }
  0x6f   : > { %810 = vmatmul.msk.f32.vlgmr.msrb.gmra.mxu1 %vm418_vm0, %v274_v14 }
  0x71   : > { %402 = vmatmul.bf16.gmra.mxu0 %v824_v43 }
  0x77   : > { %811 = vmatmul.msk.f32.gmra.mxu1 %vm418_vm0, %v275_v15 }
  0xbb   : > { %v607_v55 = vpop.permute.xlu2 %606 }
  0xdc   : > { %v408_v16 = vpop.f32.mrf.mxu1 }
  0xde   : > { %v398_v60 = vpop.f32.mrf.mxu0 }
  0xe2   : > { %v413_v17 = vpop.f32.mrf.mxu2 }
  0xe4   : > { %v410_v18 = vpop.f32.mrf.mxu1 }
  0xe6   : > { %v400_v61 = vpop.f32.mrf.mxu0 }
  0xea   : > { %v415_v19 = vpop.f32.mrf.mxu2 }
  0xeb   : > { %536 = vmatpush.msra.mxu3 %v415_v19 }
  0xec   : > { %v442_v20 = vpop.f32.mrf.mxu1 }
  0xed   : > { %537 = vmatpush.msra.mxu3 %v413_v17  ;;  %v443_v22 = vadd.f32 %v442_v20, %v288_v21 }
  0xee   : > { %v403_v2 = vpop.f32.mrf.mxu0 }
  0xef   : > { %538 = vmatpush.msra.mxu3 %v410_v18  ;;  %v448_v27 = vmul.f32 %v443_v22, %v290_v23  ;;  %v1107_v18 = vmov 16.0  }
  0xf1   : > { %539 = vmatpush.msra.mxu3 %v408_v16  ;;  %v451_v30 = vsel %vm450_vm1, %v448_v27, 0.0 }
  0xf4   : > { %v445_v26 = vpop.f32.mrf.mxu1 }
  0xf5   : > { %v446_v28 = vadd.f32 %v445_v26, %v289_v24 }
  0xf6   : > { %v405_v6 = vpop.f32.mrf.mxu0 }
  0xf7   : > { %v449_v29 = vmul.f32 %v446_v28, %v291_v25  ;;  %540 = vmatpush.msra.mxu3 %v405_v6 }
  0xf9   : > { %v452_v31 = vsel %vm450_vm1, %v449_v29, 0.0  ;;  %541 = vmatpush.msra.mxu3 %v403_v2 }
  0xfa   : > { %v453_v32 = vadd.f32 %v452_v31, %v451_v30 }
  0xfb   : > { %542 = vmatpush.msra.mxu3 %v400_v61 }
  0xfc   : > { %v454_v33 = vrot.slane %v453_v32, 4 }
  0xfd   : > { %543 = vmatpush.msra.mxu3 %v398_v60 }
  0xfe   : > { %v455_v34 = vadd.f32 %v454_v33, %v453_v32 }
 0x100   : > { %v456_v35 = vrot.slane %v455_v34, 2 }
 0x102   : > { %v457_v36 = vadd.f32 %v456_v35, %v455_v34 }
 0x104   : > { %v458_v37 = vrot.slane %v457_v36, 1 }
 0x106   : > { %v459_v38 = vadd.f32 %v458_v37, %v457_v36 }
 0x108   : > { %461 = vrot.lane.b32.xlu0 %v459_v38, %s1104_s10 }
 0x17a   : > { %v462_v44 = vpop.permute.xlu0 %461 }
 0x17b   : > { %v464_v45 = vadd.f32 %v462_v44, %v443_v22  ;;  %v465_v46 = vadd.f32 %v462_v44, %v446_v28 }
 0x17d   : > { %v468_v47 = vmul.f32 0.2, %v464_v45  ;;  %v469_v48 = vmul.f32 0.2, %v465_v46  ;;  %vm467_vm2 = vcmp.gt.f32.partialorder %v465_v46, 0.0  ;;  %vm466_vm3 = vcmp.gt.f32.partialorder %v464_v45, 0.0 }
 0x17f   : > { %v471_v49 = vsel %vm467_vm2, %v465_v46, %v469_v48  ;;  %v470_v50 = vsel %vm466_vm3, %v464_v45, %v468_v47 }
 0x180   : > { %v473_v51 = vadd.f32 %v471_v49, %v291_v25  ;;  %v472_v52 = vadd.f32 %v470_v50, %v290_v23 }
 0x182   : > { %v478_v53 = vsel %vm474_vm4, %v473_v51, -inf  ;;  %v475_v54 = vsel %vm474_vm4, %v472_v52, -inf }
 0x183   : > { %479 = vmax.xlane.f32.xlu1 %v478_v53  ;;  %476 = vmax.xlane.f32.xlu0 %v475_v54 }
 0x19c   : > { %601 = vrot.lane.b32.xlu1 %v924_v8, %s1105_s14 }
 0x1f6   : > { %v477_v62 = vpop.xlane.xlu0 %476  ;;  %v480_v0 = vpop.xlane.xlu1 %479 }
 0x1f7   : > { %v481_v63 = vsub.f32 %v472_v52, %v477_v62  ;;  %v482_v3 = vsub.f32 %v473_v51, %v480_v0 }
 0x1f9   : > { %v483_v1 = vmul.f32 1.442695, %v481_v63  ;;  %v485_v4 = vmul.f32 1.442695, %v482_v3 }
 0x1fb   : > { %925 = vpow2.f32 %v483_v1 }
 0x1fc   : > { %927 = vpow2.f32 %v485_v4 }
 0x201   : > { %v926_v5 = vpop.eup %925 }
 0x202   : > { %812 = vmatmul.msk.f32.vlgmr.msrb.gmra.mxu2 %vm474_vm4, %v926_v5  ;;  %v928_v7 = vpop.eup %927 }
 0x20a   : > { %813 = vmatmul.msk.f32.gmra.mxu2 %vm474_vm4, %v928_v7 }
 0x20e   : > { %v602_v63 = vpop.permute.xlu1 %601 }
 0x285   : > { %v510_v9 = vpop.f32.mrf.mxu2 }
 0x286   : > { %v516_v10 = vmax.f32 %v510_v9, 1e-30 }
 0x288   : > { %929 = vrcp.f32 %v516_v10 }
 0x28d   : > { %v513_v11 = vpop.f32.mrf.mxu2 }
 0x28e   : > { %v930_v12 = vpop.eup %929  ;;  %v517_v13 = vmax.f32 %v513_v11, 1e-30 }
 0x28f   : > { %v520_v14 = vmul.f32 %v930_v12, %v926_v5 }
 0x290   : > { %931 = vrcp.f32 %v517_v13 }
 0x291   : > { %613 = vrot.lane.b32.xlu2 %v520_v14, %s1106_s21  ;;  %814 = vmatmul.msk.f32.vlgmr.msra.gmra.mxu3 %vm474_vm4, %v520_v14  ;;  %933 = vrcp.f32 %v1107_v18 }
 0x296   : > { %v932_v15 = vpop.eup %931 }
 0x297   : > { %v521_v16 = vmul.f32 %v932_v15, %v928_v7  ;;  %v934_v20 = vpop.eup %933 }
 0x298   : > { %v566_v24 = vmul.f32 16.0, %v934_v20  ;;  %vm570_vm5 = vweird.f32 %v934_v20 }
 0x299   : > { %615 = vrot.lane.b32.xlu2 %v521_v16, %s1106_s21  ;;  %815 = vmatmul.msk.f32.gmra.mxu3 %vm474_vm4, %v521_v16 }
 0x29a   : > { %v567_v28 = vsub.f32 1.0, %v566_v24 }
 0x29c   : > { %v568_v31 = vmul.f32 %v934_v20, %v567_v28 }
 0x29e   : > { %v569_v34 = vadd.f32 %v934_v20, %v568_v31 }
 0x2a0   : > { %v571_v37 = vsel %vm570_vm5, %v934_v20, %v569_v34 }
 0x2eb   : > { %v614_v61 = vpop.permute.xlu2 %613 }
 0x2f3   : > { %v616_v9 = vpop.permute.xlu2 %615 }
 0x314   : > { %v545_v17 = vpop.f32.mrf.mxu3 }
 0x315   : > { %v551_v19 = vmul.f32 0.25, %v545_v17 }
 0x317   : > { %v554_v22 = vadd.f32 %v924_v8, %v551_v19 }
 0x319   : > { %v556_v26 = vsel %vm418_vm0, %v554_v22, 0.0 }
 0x31c   : > { %v548_v21 = vpop.f32.mrf.mxu3 }
 0x31d   : > { %v552_v23 = vmul.f32 0.25, %v548_v21 }
 0x31f   : > { %v555_v25 = vadd.f32 %v924_v8, %v552_v23 }
 0x321   : > { %v557_v27 = vsel %vm418_vm0, %v555_v25, 0.0 }
 0x322   : > { %v558_v29 = vadd.f32 %v557_v27, %v556_v26 }
 0x324   : > { %v559_v30 = vrot.slane %v558_v29, 4 }
 0x326   : > { %v560_v32 = vadd.f32 %v559_v30, %v558_v29 }
 0x328   : > { %v561_v33 = vrot.slane %v560_v32, 2 }
 0x32a   : > { %v562_v35 = vadd.f32 %v561_v33, %v560_v32 }
 0x32c   : > { %v563_v36 = vrot.slane %v562_v35, 1 }
 0x32e   : > { %v564_v38 = vadd.f32 %v563_v36, %v562_v35 }
 0x330   : > { %v572_v39 = vmul.f32 %v571_v37, %v564_v38 }
 0x332   : > { %v574_v40 = vsub.f32 %v555_v25, %v572_v39  ;;  %v573_v41 = vsub.f32 %v554_v22, %v572_v39 }
 0x334   : > { %v576_v42 = vmul.f32 %v574_v40, %v574_v40  ;;  %v575_v43 = vmul.f32 %v573_v41, %v573_v41 }
 0x336   : > { %v578_v44 = vsel %vm418_vm0, %v576_v42, 0.0  ;;  %v577_v45 = vsel %vm418_vm0, %v575_v43, 0.0 }
 0x337   : > { %v579_v46 = vadd.f32 %v578_v44, %v577_v45 }
 0x339   : > { %v580_v47 = vrot.slane %v579_v46, 4 }
 0x33b   : > { %v581_v48 = vadd.f32 %v580_v47, %v579_v46 }
 0x33d   : > { %v582_v49 = vrot.slane %v581_v48, 2 }
 0x33f   : > { %v583_v50 = vadd.f32 %v582_v49, %v581_v48 }
 0x341   : > { %v584_v51 = vrot.slane %v583_v50, 1 }
 0x343   : > { %v585_v52 = vadd.f32 %v584_v51, %v583_v50 }
 0x345   : > { %v586_v53 = vmul.f32 %v585_v52, %v571_v37 }
 0x347   : > { %v587_v54 = vadd.f32 1e-05, %v586_v53 }
 0x349   : > { %935 = vrsqrt.f32 %v587_v54  ;;  %vm594_vm7 = vweird.f32 %v587_v54 }
 0x34f   : > { %v936_v56 = vpop.eup %935 }
 0x350   : > { %v589_v57 = vmul.f32 %v936_v56, %v587_v54  ;;  %vm595_vm6 = vweird.f32 %v936_v56 }
 0x351   : > { %vm596_vm8 = vmor %vm594_vm7, %vm595_vm6 }
 0x352   : > { %v590_v58 = vmul.f32 %v936_v56, %v589_v57 }
 0x354   : > { %v591_v59 = vmul.f32 0.5, %v590_v58 }
 0x356   : > { %v592_v60 = vsub.f32 1.5, %v591_v59 }
 0x358   : > { %v593_v62 = vmul.f32 %v936_v56, %v592_v60 }
 0x35a   : > { %v597_v0 = vsel %vm596_vm8, %v936_v56, %v593_v62 }
 0x35b   : > { %v598_v1 = vmul.f32 %v597_v0, %v573_v41  ;;  %v599_v2 = vmul.f32 %v597_v0, %v574_v40 }
 0x35d   : > { %v604_v3 = vmul.f32 %v602_v63, %v598_v1  ;;  %v605_v4 = vmul.f32 %v602_v63, %v599_v2 }
 0x35f   : > { %v609_v5 = vadd.f32 %v607_v55, %v604_v3  ;;  %v610_v6 = vadd.f32 %v607_v55, %v605_v4 }
 0x361   : > { %v611_v7 = vmax.f32 %v609_v5, 0.0  ;;  %v612_v8 = vmax.f32 %v610_v6, 0.0 }
 0x363   : > { %v619_v10 = vsel %vm418_vm0, %v611_v7, %v614_v61  ;;  %v620_v11 = vsel %vm418_vm0, %v612_v8, %v616_v9 }
 0x364   : > { %v622_v12 = vsel %vm621_vm9, %v619_v10, 0.0  ;;  %v623_v13 = vsel %vm621_vm9, %v620_v11, 0.0 }
 0x365   : > { %624 = vst [vmem:[%s273_s23] sm:$0xff] %v622_v12 }
 0x366   : > { %625 = vst [vmem:[%s273_s23 + $0x8] sm:$0xff] %v623_v13 }
 0x367   : > { %1054 = shalt.err (!%p1051_p4)
}
 0x368   : > { %s1108_s20 = smov 128   ;;  %s1109_s14 = smov 8  }
 0x369   : > { %860 = dma.vmem_to_hbm [thread:$0]  (%p1220_p9), %s640_s26, 256, %s642_s9, %s627_s27, %s1108_s20, %s1108_s20, %s1109_s14  }
 0x36a PF: > { %p880_p6 = scmp.ge.s32.totalorder %s1097_s18, 2  ;;  %s656_s21 = sand.u32 1, %s1085_s15  }
 0x36b   : > { %s657_s29 = scalar_lea.sflag [#allocation4], %s656_s21 }
 0x36c   : > { %p874_p11 = pnand %p880_p6, %p1224_p10 }
 0x36e   : > { %p875_p0 = pneg %p874_p11 }
 0x370   : > { %1080 = dma.done.wait (%p875_p0), %s657_s29, 256  }
 0x371   : > { %1082 = vsyncadd (%p875_p0), %s657_s29, 4294967040  ;;  %p18_p7 = scmp.ge.s32.totalorder %s1156_s19, 10   ;;  %s1375_s15 = smov %s1089_s16 }
 0x372   : > { %s1376_s16 = smov %s1093_s17  ;;  %s1377_s17 = smov %s1165_s22 }
 0x373   : > { %s1378_s18 = smov %s1156_s19  ;;  %20 = sbr.rel (!%p18_p7) target bundleno = 6 (0x6), region = 97 }
 0x378   :  { %663 = vsyncpa [#allocation3], 1 }
 0x379   :  { %665 = vsyncpa [#allocation3 + $0x1], 1 }
 0x37a   :  { %666 = vsyncpa [#allocation6], 1 }
 0x37b   :  { %668 = vsyncpa [#allocation6 + $0x1], 1 }
 0x37c   :  { %669 = vsyncpa [#allocation4], 1 }
 0x37d   :  { %671 = vsyncpa [#allocation4 + $0x1], 1 }

</bundles_post_ra>
